<compile_context>
chip_gen: v7x
topology: tpu7x:2x2x1
jax: 0.10.0
libtpu: 0.0.40
codegen_flags: <defaults>
</compile_context>

<pallas_src>
import math

import jax
import jax.numpy as jnp
from jax.experimental import pallas as pl
from jax.experimental.pallas import tpu as pltpu


def make_gaussian_taps(w):
    """1-D factor of SpatialStep's Gaussian, normalized to sum to 1.

    outer(g, g) equals the module's normalized 2-D kernel exactly, because
    kernel[i, j] = A * exp(-(i-mean)^2/(2 var)) * exp(-(j-mean)^2/(2 var))
    and the normalization factorizes (the 1/(2*pi*var) constant cancels).
    """
    mean = (w - 1) / 2.0
    var = float((3 * w) ** 2)
    i = jnp.arange(w + 1, dtype=jnp.float32)
    g = jnp.exp(-((i - mean) ** 2) / (2.0 * var))
    return g / jnp.sum(g)


def make_gaussian_depthwise_weights(c, w, h):
    """Mirror SpatialStep.__init__ exactly (used by the pure-JAX reference)."""
    x_coord = jnp.arange(w + 1, dtype=jnp.float32)
    x_grid = jnp.tile(x_coord, (h + 1,)).reshape(w + 1, h + 1)   # x_grid[i, j] = j
    xy_grid = jnp.stack([x_grid, x_grid.T], axis=-1)             # (w+1, h+1, 2)
    mean = (w - 1) / 2.0
    var = float((3 * w) ** 2)
    kernel = (1.0 / (2.0 * math.pi * var)) * jnp.exp(
        -jnp.sum((xy_grid - mean) ** 2, axis=-1) / (2.0 * var))
    norm_kernel = kernel / jnp.sum(kernel)
    return jnp.broadcast_to(norm_kernel[None], (c, w + 1, h + 1)).astype(jnp.float32)


def _tree_sum(terms):
    """Balanced pairwise sum of a Python list of same-shaped values (better ILP
    than a serial accumulator chain)."""
    while len(terms) > 1:
        nxt = [terms[i] + terms[i + 1] for i in range(0, len(terms) - 1, 2)]
        if len(terms) % 2:
            nxt.append(terms[-1])
        terms = nxt
    return terms[0]


def spatial_step_kernel(g_ref, x_ref, o_ref):
    """Separable depthwise Gaussian blur for one batch element.

    g_ref: (K,)           1-D Gaussian taps in SMEM (read as scalars, once each)
    x_ref: (1, Hp, C*Wp)  reflect-padded planes; lanes = channel-major padded
                          image columns (VMEM)
    o_ref: (1, H, C*Wp)   blurred planes; within each Wp-lane group only lanes
                          j < W hold valid output (wrapper slices them out)
    """
    K = g_ref.shape[0]
    H = o_ref.shape[1]
    L = o_ref.shape[2]            # C * Wp lanes

    # Each SMEM tap is read exactly once and reused by both passes.
    taps = [g_ref[k] for k in range(K)]

    # ---- Row (image-height) pass -------------------------------------------
    # Sublane-offset slices straight from the Ref (offset vlds, no XLU work),
    # each scaled by a scalar tap; 17 independent products, tree-summed.
    v = _tree_sum([taps[k] * x_ref[0, k:k + H, :] for k in range(K)])

    # ---- Column (image-width) pass ------------------------------------------
    # Each channel's padded width Wp lives contiguously on the lane axis.
    # Output column j (j < W) only needs columns j + k <= Wp - 1 of the *same*
    # channel group, so a full-width lane roll never mixes neighbouring
    # channels for the lanes we keep.  Rolls run on the XLU, off the VPU's
    # critical slot.  (Shifts must be static, hence a Python loop.)
    col_terms = [taps[0] * v]
    for k in range(1, K):
        col_terms.append(taps[k] * pltpu.roll(v, L - k, axis=1))
    acc = _tree_sum(col_terms)

    o_ref[0] = acc.astype(o_ref.dtype)


def spatial_step(x, g):
    """x: (N, C, H, W) float32, g: (K,) float32 1-D Gaussian taps."""
    n, c, h, w = x.shape
    k = g.shape[0]                      # == w + 1 in the module
    pad = w // 2                        # mirrors the PyTorch module

    # Reflect padding (padding_mode='reflect') — wrapper glue, not hot path.
    x_pad = jnp.pad(x, ((0, 0), (0, 0), (pad, pad), (pad, pad)), mode="reflect")
    hp, wp = x_pad.shape[2], x_pad.shape[3]
    out_h = hp - k + 1
    out_w = wp - k + 1

    # Lane-dense layout: (N, Hp, C*Wp).  For (2, 4, 16, 16) this puts exactly
    # 128 values on the lane axis, so every vector load/store is full width.
    xl = jnp.transpose(x_pad, (0, 2, 1, 3)).reshape(n, hp, c * wp)

    out = pl.pallas_call(
        spatial_step_kernel,
        out_shape=jax.ShapeDtypeStruct((n, out_h, c * wp), x.dtype),
        grid_spec=pltpu.PrefetchScalarGridSpec(
            num_scalar_prefetch=0,
            grid=(n,),                  # 2 parallel steps: feeds both v7x TCs
            in_specs=[
                # One copy of the 17 taps, resident in SMEM for scalar reads.
                pl.BlockSpec(memory_space=pltpu.MemorySpace.SMEM),
                pl.BlockSpec((1, hp, c * wp), lambda i: (i, 0, 0)),
            ],
            out_specs=pl.BlockSpec((1, out_h, c * wp), lambda i: (i, 0, 0)),
        ),
        compiler_params=pltpu.CompilerParams(
            dimension_semantics=("parallel",)),
    )(g, xl)

    # Drop the discarded lanes j >= out_w of each Wp group, restore NCHW.
    out = out.reshape(n, out_h, c, wp)[..., :out_w]
    return jnp.transpose(out, (0, 2, 1, 3))


def spatial_step_reference(x, weights):
    """Pure-JAX reference: full 2-D depthwise conv on the reflect-padded input."""
    n, c, h, w = x.shape
    pad = w // 2
    x_pad = jnp.pad(x, ((0, 0), (0, 0), (pad, pad), (pad, pad)), mode="reflect")
    w_oihw = weights[:, None, :, :]     # (C, 1, Kh, Kw)
    return jax.lax.conv_general_dilated(
        x_pad, w_oihw,
        window_strides=(1, 1), padding="VALID",
        dimension_numbers=("NCHW", "OIHW", "NCHW"),
        feature_group_count=c)


if __name__ == "__main__":
    N, C, H, W = 2, 4, 16, 16           # input_shape passed to SpatialStep.__init__
    key = jax.random.PRNGKey(0)
    x = jax.random.normal(key, (N, C, H, W), dtype=jnp.float32)

    g = make_gaussian_taps(W)           # (17,) separable taps
    out = jax.block_until_ready(spatial_step(x, g))

    # Reference uses the exact (non-separated) 2-D kernel construction, so this
    # also validates the separability rewrite numerically.
    w2d = make_gaussian_depthwise_weights(C, W, H)          # (C, 17, 17)
    ref = spatial_step_reference(x, w2d)

    assert out.shape == (N, C, H, W), out.shape
    assert jnp.allclose(out, ref, atol=1e-5, rtol=1e-5), "mismatch vs reference conv"

    print("KERNEL_OK")
</pallas_src>

<mosaic_0001>
module attributes {stable_mosaic.version = 11 : i64} {
  func.func @spatial_step_kernel(%arg0: i32, %arg1: memref<17xf32, #tpu.memory_space<smem>>, %arg2: memref<1x32x128xf32, #tpu.memory_space<vmem>>, %arg3: memref<1x16x128xf32, #tpu.memory_space<vmem>>) attributes {dimension_semantics = [#tpu.dimension_semantics<parallel>], iteration_bounds = array<i64: 2>, scalar_prefetch = 0 : i64, scratch_operands = 0 : i64, tpu.core_type = #tpu.core_type<tc>, window_params = [{transform_indices = @transform_0, window_bounds = array<i64: 17>}, {transform_indices = @transform_1, window_bounds = array<i64: 1, 32, 128>}, {transform_indices = @transform_2, window_bounds = array<i64: 1, 16, 128>}]} {
    %c0 = arith.constant 0 : index
    %0 = memref.load %arg1[%c0] : memref<17xf32, #tpu.memory_space<smem>>
    %c1 = arith.constant 1 : index
    %1 = memref.load %arg1[%c1] : memref<17xf32, #tpu.memory_space<smem>>
    %c2 = arith.constant 2 : index
    %2 = memref.load %arg1[%c2] : memref<17xf32, #tpu.memory_space<smem>>
    %c3 = arith.constant 3 : index
    %3 = memref.load %arg1[%c3] : memref<17xf32, #tpu.memory_space<smem>>
    %c4 = arith.constant 4 : index
    %4 = memref.load %arg1[%c4] : memref<17xf32, #tpu.memory_space<smem>>
    %c5 = arith.constant 5 : index
    %5 = memref.load %arg1[%c5] : memref<17xf32, #tpu.memory_space<smem>>
    %c6 = arith.constant 6 : index
    %6 = memref.load %arg1[%c6] : memref<17xf32, #tpu.memory_space<smem>>
    %c7 = arith.constant 7 : index
    %7 = memref.load %arg1[%c7] : memref<17xf32, #tpu.memory_space<smem>>
    %c8 = arith.constant 8 : index
    %8 = memref.load %arg1[%c8] : memref<17xf32, #tpu.memory_space<smem>>
    %c9 = arith.constant 9 : index
    %9 = memref.load %arg1[%c9] : memref<17xf32, #tpu.memory_space<smem>>
    %c10 = arith.constant 10 : index
    %10 = memref.load %arg1[%c10] : memref<17xf32, #tpu.memory_space<smem>>
    %c11 = arith.constant 11 : index
    %11 = memref.load %arg1[%c11] : memref<17xf32, #tpu.memory_space<smem>>
    %c12 = arith.constant 12 : index
    %12 = memref.load %arg1[%c12] : memref<17xf32, #tpu.memory_space<smem>>
    %c13 = arith.constant 13 : index
    %13 = memref.load %arg1[%c13] : memref<17xf32, #tpu.memory_space<smem>>
    %c14 = arith.constant 14 : index
    %14 = memref.load %arg1[%c14] : memref<17xf32, #tpu.memory_space<smem>>
    %c15 = arith.constant 15 : index
    %15 = memref.load %arg1[%c15] : memref<17xf32, #tpu.memory_space<smem>>
    %c16 = arith.constant 16 : index
    %16 = memref.load %arg1[%c16] : memref<17xf32, #tpu.memory_space<smem>>
    %c0_0 = arith.constant 0 : index
    %c0_1 = arith.constant 0 : index
    %c0_2 = arith.constant 0 : index
    %17 = vector.load %arg2[%c0_0, %c0_1, %c0_2] : memref<1x32x128xf32, #tpu.memory_space<vmem>>, vector<1x16x128xf32>
    %18 = vector.shape_cast %17 : vector<1x16x128xf32> to vector<16x128xf32>
    %19 = vector.broadcast %0 : f32 to vector<16x128xf32>
    %20 = arith.mulf %19, %18 : vector<16x128xf32>
    %c0_3 = arith.constant 0 : index
    %c1_4 = arith.constant 1 : index
    %c0_5 = arith.constant 0 : index
    %21 = vector.load %arg2[%c0_3, %c1_4, %c0_5] : memref<1x32x128xf32, #tpu.memory_space<vmem>>, vector<1x16x128xf32>
    %22 = vector.shape_cast %21 : vector<1x16x128xf32> to vector<16x128xf32>
    %23 = vector.broadcast %1 : f32 to vector<16x128xf32>
    %24 = arith.mulf %23, %22 : vector<16x128xf32>
    %c0_6 = arith.constant 0 : index
    %c2_7 = arith.constant 2 : index
    %c0_8 = arith.constant 0 : index
    %25 = vector.load %arg2[%c0_6, %c2_7, %c0_8] : memref<1x32x128xf32, #tpu.memory_space<vmem>>, vector<1x16x128xf32>
    %26 = vector.shape_cast %25 : vector<1x16x128xf32> to vector<16x128xf32>
    %27 = vector.broadcast %2 : f32 to vector<16x128xf32>
    %28 = arith.mulf %27, %26 : vector<16x128xf32>
    %c0_9 = arith.constant 0 : index
    %c3_10 = arith.constant 3 : index
    %c0_11 = arith.constant 0 : index
    %29 = vector.load %arg2[%c0_9, %c3_10, %c0_11] : memref<1x32x128xf32, #tpu.memory_space<vmem>>, vector<1x16x128xf32>
    %30 = vector.shape_cast %29 : vector<1x16x128xf32> to vector<16x128xf32>
    %31 = vector.broadcast %3 : f32 to vector<16x128xf32>
    %32 = arith.mulf %31, %30 : vector<16x128xf32>
    %c0_12 = arith.constant 0 : index
    %c4_13 = arith.constant 4 : index
    %c0_14 = arith.constant 0 : index
    %33 = vector.load %arg2[%c0_12, %c4_13, %c0_14] : memref<1x32x128xf32, #tpu.memory_space<vmem>>, vector<1x16x128xf32>
    %34 = vector.shape_cast %33 : vector<1x16x128xf32> to vector<16x128xf32>
    %35 = vector.broadcast %4 : f32 to vector<16x128xf32>
    %36 = arith.mulf %35, %34 : vector<16x128xf32>
    %c0_15 = arith.constant 0 : index
    %c5_16 = arith.constant 5 : index
    %c0_17 = arith.constant 0 : index
    %37 = vector.load %arg2[%c0_15, %c5_16, %c0_17] : memref<1x32x128xf32, #tpu.memory_space<vmem>>, vector<1x16x128xf32>
    %38 = vector.shape_cast %37 : vector<1x16x128xf32> to vector<16x128xf32>
    %39 = vector.broadcast %5 : f32 to vector<16x128xf32>
    %40 = arith.mulf %39, %38 : vector<16x128xf32>
    %c0_18 = arith.constant 0 : index
    %c6_19 = arith.constant 6 : index
    %c0_20 = arith.constant 0 : index
    %41 = vector.load %arg2[%c0_18, %c6_19, %c0_20] : memref<1x32x128xf32, #tpu.memory_space<vmem>>, vector<1x16x128xf32>
    %42 = vector.shape_cast %41 : vector<1x16x128xf32> to vector<16x128xf32>
    %43 = vector.broadcast %6 : f32 to vector<16x128xf32>
    %44 = arith.mulf %43, %42 : vector<16x128xf32>
    %c0_21 = arith.constant 0 : index
    %c7_22 = arith.constant 7 : index
    %c0_23 = arith.constant 0 : index
    %45 = vector.load %arg2[%c0_21, %c7_22, %c0_23] : memref<1x32x128xf32, #tpu.memory_space<vmem>>, vector<1x16x128xf32>
    %46 = vector.shape_cast %45 : vector<1x16x128xf32> to vector<16x128xf32>
    %47 = vector.broadcast %7 : f32 to vector<16x128xf32>
    %48 = arith.mulf %47, %46 : vector<16x128xf32>
    %c0_24 = arith.constant 0 : index
    %c8_25 = arith.constant 8 : index
    %c0_26 = arith.constant 0 : index
    %49 = vector.load %arg2[%c0_24, %c8_25, %c0_26] : memref<1x32x128xf32, #tpu.memory_space<vmem>>, vector<1x16x128xf32>
    %50 = vector.shape_cast %49 : vector<1x16x128xf32> to vector<16x128xf32>
    %51 = vector.broadcast %8 : f32 to vector<16x128xf32>
    %52 = arith.mulf %51, %50 : vector<16x128xf32>
    %c0_27 = arith.constant 0 : index
    %c9_28 = arith.constant 9 : index
    %c0_29 = arith.constant 0 : index
    %53 = vector.load %arg2[%c0_27, %c9_28, %c0_29] : memref<1x32x128xf32, #tpu.memory_space<vmem>>, vector<1x16x128xf32>
    %54 = vector.shape_cast %53 : vector<1x16x128xf32> to vector<16x128xf32>
    %55 = vector.broadcast %9 : f32 to vector<16x128xf32>
    %56 = arith.mulf %55, %54 : vector<16x128xf32>
    %c0_30 = arith.constant 0 : index
    %c10_31 = arith.constant 10 : index
    %c0_32 = arith.constant 0 : index
    %57 = vector.load %arg2[%c0_30, %c10_31, %c0_32] : memref<1x32x128xf32, #tpu.memory_space<vmem>>, vector<1x16x128xf32>
    %58 = vector.shape_cast %57 : vector<1x16x128xf32> to vector<16x128xf32>
    %59 = vector.broadcast %10 : f32 to vector<16x128xf32>
    %60 = arith.mulf %59, %58 : vector<16x128xf32>
    %c0_33 = arith.constant 0 : index
    %c11_34 = arith.constant 11 : index
    %c0_35 = arith.constant 0 : index
    %61 = vector.load %arg2[%c0_33, %c11_34, %c0_35] : memref<1x32x128xf32, #tpu.memory_space<vmem>>, vector<1x16x128xf32>
    %62 = vector.shape_cast %61 : vector<1x16x128xf32> to vector<16x128xf32>
    %63 = vector.broadcast %11 : f32 to vector<16x128xf32>
    %64 = arith.mulf %63, %62 : vector<16x128xf32>
    %c0_36 = arith.constant 0 : index
    %c12_37 = arith.constant 12 : index
    %c0_38 = arith.constant 0 : index
    %65 = vector.load %arg2[%c0_36, %c12_37, %c0_38] : memref<1x32x128xf32, #tpu.memory_space<vmem>>, vector<1x16x128xf32>
    %66 = vector.shape_cast %65 : vector<1x16x128xf32> to vector<16x128xf32>
    %67 = vector.broadcast %12 : f32 to vector<16x128xf32>
    %68 = arith.mulf %67, %66 : vector<16x128xf32>
    %c0_39 = arith.constant 0 : index
    %c13_40 = arith.constant 13 : index
    %c0_41 = arith.constant 0 : index
    %69 = vector.load %arg2[%c0_39, %c13_40, %c0_41] : memref<1x32x128xf32, #tpu.memory_space<vmem>>, vector<1x16x128xf32>
    %70 = vector.shape_cast %69 : vector<1x16x128xf32> to vector<16x128xf32>
    %71 = vector.broadcast %13 : f32 to vector<16x128xf32>
    %72 = arith.mulf %71, %70 : vector<16x128xf32>
    %c0_42 = arith.constant 0 : index
    %c14_43 = arith.constant 14 : index
    %c0_44 = arith.constant 0 : index
    %73 = vector.load %arg2[%c0_42, %c14_43, %c0_44] : memref<1x32x128xf32, #tpu.memory_space<vmem>>, vector<1x16x128xf32>
    %74 = vector.shape_cast %73 : vector<1x16x128xf32> to vector<16x128xf32>
    %75 = vector.broadcast %14 : f32 to vector<16x128xf32>
    %76 = arith.mulf %75, %74 : vector<16x128xf32>
    %c0_45 = arith.constant 0 : index
    %c15_46 = arith.constant 15 : index
    %c0_47 = arith.constant 0 : index
    %77 = vector.load %arg2[%c0_45, %c15_46, %c0_47] : memref<1x32x128xf32, #tpu.memory_space<vmem>>, vector<1x16x128xf32>
    %78 = vector.shape_cast %77 : vector<1x16x128xf32> to vector<16x128xf32>
    %79 = vector.broadcast %15 : f32 to vector<16x128xf32>
    %80 = arith.mulf %79, %78 : vector<16x128xf32>
    %c0_48 = arith.constant 0 : index
    %c16_49 = arith.constant 16 : index
    %c0_50 = arith.constant 0 : index
    %81 = vector.load %arg2[%c0_48, %c16_49, %c0_50] : memref<1x32x128xf32, #tpu.memory_space<vmem>>, vector<1x16x128xf32>
    %82 = vector.shape_cast %81 : vector<1x16x128xf32> to vector<16x128xf32>
    %83 = vector.broadcast %16 : f32 to vector<16x128xf32>
    %84 = arith.mulf %83, %82 : vector<16x128xf32>
    %85 = arith.addf %20, %24 : vector<16x128xf32>
    %86 = arith.addf %28, %32 : vector<16x128xf32>
    %87 = arith.addf %36, %40 : vector<16x128xf32>
    %88 = arith.addf %44, %48 : vector<16x128xf32>
    %89 = arith.addf %52, %56 : vector<16x128xf32>
    %90 = arith.addf %60, %64 : vector<16x128xf32>
    %91 = arith.addf %68, %72 : vector<16x128xf32>
    %92 = arith.addf %76, %80 : vector<16x128xf32>
    %93 = arith.addf %85, %86 : vector<16x128xf32>
    %94 = arith.addf %87, %88 : vector<16x128xf32>
    %95 = arith.addf %89, %90 : vector<16x128xf32>
    %96 = arith.addf %91, %92 : vector<16x128xf32>
    %97 = arith.addf %93, %94 : vector<16x128xf32>
    %98 = arith.addf %95, %96 : vector<16x128xf32>
    %99 = arith.addf %97, %98 : vector<16x128xf32>
    %100 = arith.addf %99, %84 : vector<16x128xf32>
    %101 = vector.broadcast %0 : f32 to vector<16x128xf32>
    %102 = arith.mulf %101, %100 : vector<16x128xf32>
    %c127_i32 = arith.constant 127 : i32
    %103 = tpu.dynamic_rotate %100 by %c127_i32 dim 1 : vector<16x128xf32>, i32 -> vector<16x128xf32>
    %104 = vector.broadcast %1 : f32 to vector<16x128xf32>
    %105 = arith.mulf %104, %103 : vector<16x128xf32>
    %c126_i32 = arith.constant 126 : i32
    %106 = tpu.dynamic_rotate %100 by %c126_i32 dim 1 : vector<16x128xf32>, i32 -> vector<16x128xf32>
    %107 = vector.broadcast %2 : f32 to vector<16x128xf32>
    %108 = arith.mulf %107, %106 : vector<16x128xf32>
    %c125_i32 = arith.constant 125 : i32
    %109 = tpu.dynamic_rotate %100 by %c125_i32 dim 1 : vector<16x128xf32>, i32 -> vector<16x128xf32>
    %110 = vector.broadcast %3 : f32 to vector<16x128xf32>
    %111 = arith.mulf %110, %109 : vector<16x128xf32>
    %c124_i32 = arith.constant 124 : i32
    %112 = tpu.dynamic_rotate %100 by %c124_i32 dim 1 : vector<16x128xf32>, i32 -> vector<16x128xf32>
    %113 = vector.broadcast %4 : f32 to vector<16x128xf32>
    %114 = arith.mulf %113, %112 : vector<16x128xf32>
    %c123_i32 = arith.constant 123 : i32
    %115 = tpu.dynamic_rotate %100 by %c123_i32 dim 1 : vector<16x128xf32>, i32 -> vector<16x128xf32>
    %116 = vector.broadcast %5 : f32 to vector<16x128xf32>
    %117 = arith.mulf %116, %115 : vector<16x128xf32>
    %c122_i32 = arith.constant 122 : i32
    %118 = tpu.dynamic_rotate %100 by %c122_i32 dim 1 : vector<16x128xf32>, i32 -> vector<16x128xf32>
    %119 = vector.broadcast %6 : f32 to vector<16x128xf32>
    %120 = arith.mulf %119, %118 : vector<16x128xf32>
    %c121_i32 = arith.constant 121 : i32
    %121 = tpu.dynamic_rotate %100 by %c121_i32 dim 1 : vector<16x128xf32>, i32 -> vector<16x128xf32>
    %122 = vector.broadcast %7 : f32 to vector<16x128xf32>
    %123 = arith.mulf %122, %121 : vector<16x128xf32>
    %c120_i32 = arith.constant 120 : i32
    %124 = tpu.dynamic_rotate %100 by %c120_i32 dim 1 : vector<16x128xf32>, i32 -> vector<16x128xf32>
    %125 = vector.broadcast %8 : f32 to vector<16x128xf32>
    %126 = arith.mulf %125, %124 : vector<16x128xf32>
    %c119_i32 = arith.constant 119 : i32
    %127 = tpu.dynamic_rotate %100 by %c119_i32 dim 1 : vector<16x128xf32>, i32 -> vector<16x128xf32>
    %128 = vector.broadcast %9 : f32 to vector<16x128xf32>
    %129 = arith.mulf %128, %127 : vector<16x128xf32>
    %c118_i32 = arith.constant 118 : i32
    %130 = tpu.dynamic_rotate %100 by %c118_i32 dim 1 : vector<16x128xf32>, i32 -> vector<16x128xf32>
    %131 = vector.broadcast %10 : f32 to vector<16x128xf32>
    %132 = arith.mulf %131, %130 : vector<16x128xf32>
    %c117_i32 = arith.constant 117 : i32
    %133 = tpu.dynamic_rotate %100 by %c117_i32 dim 1 : vector<16x128xf32>, i32 -> vector<16x128xf32>
    %134 = vector.broadcast %11 : f32 to vector<16x128xf32>
    %135 = arith.mulf %134, %133 : vector<16x128xf32>
    %c116_i32 = arith.constant 116 : i32
    %136 = tpu.dynamic_rotate %100 by %c116_i32 dim 1 : vector<16x128xf32>, i32 -> vector<16x128xf32>
    %137 = vector.broadcast %12 : f32 to vector<16x128xf32>
    %138 = arith.mulf %137, %136 : vector<16x128xf32>
    %c115_i32 = arith.constant 115 : i32
    %139 = tpu.dynamic_rotate %100 by %c115_i32 dim 1 : vector<16x128xf32>, i32 -> vector<16x128xf32>
    %140 = vector.broadcast %13 : f32 to vector<16x128xf32>
    %141 = arith.mulf %140, %139 : vector<16x128xf32>
    %c114_i32 = arith.constant 114 : i32
    %142 = tpu.dynamic_rotate %100 by %c114_i32 dim 1 : vector<16x128xf32>, i32 -> vector<16x128xf32>
    %143 = vector.broadcast %14 : f32 to vector<16x128xf32>
    %144 = arith.mulf %143, %142 : vector<16x128xf32>
    %c113_i32 = arith.constant 113 : i32
    %145 = tpu.dynamic_rotate %100 by %c113_i32 dim 1 : vector<16x128xf32>, i32 -> vector<16x128xf32>
    %146 = vector.broadcast %15 : f32 to vector<16x128xf32>
    %147 = arith.mulf %146, %145 : vector<16x128xf32>
    %c112_i32 = arith.constant 112 : i32
    %148 = tpu.dynamic_rotate %100 by %c112_i32 dim 1 : vector<16x128xf32>, i32 -> vector<16x128xf32>
    %149 = vector.broadcast %16 : f32 to vector<16x128xf32>
    %150 = arith.mulf %149, %148 : vector<16x128xf32>
    %151 = arith.addf %102, %105 : vector<16x128xf32>
    %152 = arith.addf %108, %111 : vector<16x128xf32>
    %153 = arith.addf %114, %117 : vector<16x128xf32>
    %154 = arith.addf %120, %123 : vector<16x128xf32>
    %155 = arith.addf %126, %129 : vector<16x128xf32>
    %156 = arith.addf %132, %135 : vector<16x128xf32>
    %157 = arith.addf %138, %141 : vector<16x128xf32>
    %158 = arith.addf %144, %147 : vector<16x128xf32>
    %159 = arith.addf %151, %152 : vector<16x128xf32>
    %160 = arith.addf %153, %154 : vector<16x128xf32>
    %161 = arith.addf %155, %156 : vector<16x128xf32>
    %162 = arith.addf %157, %158 : vector<16x128xf32>
    %163 = arith.addf %159, %160 : vector<16x128xf32>
    %164 = arith.addf %161, %162 : vector<16x128xf32>
    %165 = arith.addf %163, %164 : vector<16x128xf32>
    %166 = arith.addf %165, %150 : vector<16x128xf32>
    %c0_51 = arith.constant 0 : index
    %c0_52 = arith.constant 0 : index
    %c0_53 = arith.constant 0 : index
    %167 = vector.load %arg3[%c0_51, %c0_52, %c0_53] : memref<1x16x128xf32, #tpu.memory_space<vmem>>, vector<1x16x128xf32>
    %168 = vector.shape_cast %167 : vector<1x16x128xf32> to vector<16x128xf32>
    %169 = vector.shape_cast %166 : vector<16x128xf32> to vector<1x16x128xf32>
    tpu.vector_store %arg3[%c0_51, %c0_52, %c0_53], %169 {strides = array<i32>} : memref<1x16x128xf32, #tpu.memory_space<vmem>>, vector<1x16x128xf32>,
    return
  }
  func.func @transform_0(%arg0: i32) -> i32 {
    %c0_i32 = arith.constant 0 : i32
    %c0_i32_0 = arith.constant 0 : i32
    return %c0_i32 : i32
  }
  func.func @transform_1(%arg0: i32) -> (i32, i32, i32) {
    %c0_i32 = arith.constant 0 : i32
    %c0_i32_0 = arith.constant 0 : i32
    %c0_i32_1 = arith.constant 0 : i32
    return %arg0, %c0_i32, %c0_i32_0 : i32, i32, i32
  }
  func.func @transform_2(%arg0: i32) -> (i32, i32, i32) {
    %c0_i32 = arith.constant 0 : i32
    %c0_i32_0 = arith.constant 0 : i32
    %c0_i32_1 = arith.constant 0 : i32
    return %arg0, %c0_i32, %c0_i32_0 : i32, i32, i32
  }
}

</mosaic_0001>

<bundles_post_ra>
// kernel: tpu_custom_call.1
= control target key start
LH: loop header
LB: loop body
LE: loop exit
PB: predicated region body
PF: predicated region fallthrough
CT: control target
= control target key end

     0   :  { %7 = vsyncpa [#allocation5], 0  ;;  %s1176_s0 = inlined_call_operand.hbm [shape: f32[17], index: 0, kind: input, shape index: {}]   ;;  %s1177_s1 = inlined_call_operand.hbm [shape: f32[2,32,128], index: 1, kind: input, shape index: {}]   ;;  %s1178_s2 = inlined_call_operand.hbm [shape: f32[2,16,128], index: 2, kind: output, shape index: {}]  }
   0x1   :  { %8 = vsyncpa [#allocation3], 0 }
   0x2   :  { %10 = vsyncpa [#allocation3 + $0x1], 0 }
   0x3   :  { %11 = vsyncpa [#allocation4], 0 }
   0x4   :  { %13 = vsyncpa [#allocation4 + $0x1], 0  ;;  %s795_s9 = smov 0   ;;  %s797_s10 = smov 0  }
   0x5   :  { %s799_s11 = smov 0   ;;  %s801_s12 = smov 0  }
   0x6 LB: > { %s816_s13 = sadd.s32 4294967295, %s755_s12   ;;  %s531_s14 = sadd.s32 4294967294, %s755_s12   ;;  %s755_s12 = sphi %s801_s12, %s1198_s12   ;;  %s751_s11 = sphi %s799_s11, %s1197_s11   ;;  %s747_s10 = sphi %s797_s10, %s1196_s10   ;;  %s743_s9 = sphi %s795_s9, %s1195_s9  }
   0x7   : > { %s820_s15 = sadd.s32 1, %s755_s12   ;;  %s47_s16 = sadd.s32 1, %s751_s11 }
   0x8   : > { %s44_s17 = ssub.s32 %s755_s12, %s820_s15  ;;  %p54_p0 = scmp.ne.s32.totalorder %s751_s11, %s747_s10 }
   0x9   : > { %p45_p1 = scmp.eq.s32.totalorder %s44_s17, 0  ;;  %p55_p2 = scmp.eq.s32.totalorder %s755_s12, 0 }
   0xa   : > { %p60_p3 = scmp.ne.s32.totalorder %s747_s10, %s743_s9  ;;  %p1179_p4 = scmp.eq.s32.totalorder %s816_s13, 0 }
   0xb   : > { %s832_s18 = scalar_select %p45_p1, %s751_s11, %s47_s16  }
   0xc   : > { %p834_p5 = por %p55_p2, %p54_p0  ;;  %p840_p6 = por %p1179_p4, %p60_p3 }
   0xd   : > { %p84_p7 = scmp.eq.s32.totalorder %s816_s13, 1  ;;  %p90_p8 = scmp.eq.s32.totalorder %s531_s14, 1 }
   0xe   : > { %s1183_s20 = scalar_select %p840_p6, 1, 0 }
   0xf   : > { %p532_p9 = scmp.ge.s32.totalorder %s755_s12, 1  ;;  %p97_p10 = scmp.lt.s32.totalorder %s755_s12, 3 }
  0x10   : > { %p847_p11 = por %p84_p7, %p54_p0  ;;  %p851_p12 = por %p90_p8, %p60_p3 }
  0x11   : > { %p855_p13 = pnand %p532_p9, %p97_p10  ;;  %p586_p4 = scmp.lt.s32.totalorder %s755_s12, 2 }
  0x12   : > { %s1184_s21 = scalar_select %p847_p11, 1, 0 }
  0x13   : > { %s1185_s22 = scalar_select %p851_p12, 1, 0 }
  0x14   : > { %p573_p2 = pneg %p855_p13  ;;  %s119_s24 = sand.u32 1, %s751_s11  }
  0x15   : > { %s563_s25 = sshll.u32 %s755_s12, 9  ;;  %p1187_p6 = scmp.eq.s32.totalorder %s816_s13, 0 }
  0x16   : > { %p869_p7 = pnand %p586_p4, %p834_p5  ;;  %s535_s27 = sshll.u32 %s119_s24, 5 }
  0x17   : > { %p574_p0 = pnand %p573_p2, %p1187_p6  ;;  %s642_s30 = scalar_lea.hbm %s1176_s0, 16 }
  0x18   : > { %p643_p3 = scmp.ne.s32.totalorder %s1176_s0, %s642_s30  ;;  %p649_p6 = scmp.lt.u32.totalorder %s642_s30, %s1176_s0 }
  0x19   : > { %p644_p8 = pneg %p574_p0 }
  0x1b   : > { %p645_p9 = pnand %p644_p8, %p643_p3 }
  0x1d   : > { %p646_p10 = pneg %p645_p9 }
  0x1f   : > { %p651_p4 = pnand %p649_p6, %p646_p10 }
  0x21   : > { %654 = shalt.err (!%p651_p4)
}
  0x22   : > { %s757_s7 = smov [#allocation2]   ;;  %s888_s19 = scalar_lea.hbm %s1177_s1, %s563_s25 }
  0x23   : > { %576 = dma.hbm_to_smem (!%p574_p0), %s1176_s0, 16, %s757_s7, [#allocation5]  }
  0x24   : > { %s123_s28 = scalar_lea.vmem [#allocation6], %s535_s27  ;;  %s892_s30 = scalar_lea.sflag [#allocation3], %s119_s24 }
  0x25   : > { %s130_s29 = sshll.u32 %s123_s28, 4  ;;  %s655_s3 = scalar_lea.hbm %s888_s19, 512  ;;  %s890_s29 = int_to_ptr.vmem [resolvable:$true] %s130_s29 }
  0x26   : > { %p656_p5 = scmp.ne.s32.totalorder %s888_s19, %s655_s3  ;;  %p657_p2 = pneg %p869_p7 }
  0x27   : > { %s660_s5 = scalar_lea.hbm %s1177_s1, 1024  ;;  %p661_p8 = scmp.lt.u32.totalorder %s888_s19, %s1177_s1 }
  0x28   : > { %p658_p0 = pnand %p657_p2, %p656_p5  ;;  %p662_p9 = scmp.lt.u32.totalorder %s660_s5, %s655_s3 }
  0x29   : > { %p664_p6 = scmp.lt.u32.totalorder %s655_s3, %s888_s19 }
  0x2a   : > { %p659_p3 = pneg %p658_p0  ;;  %p663_p10 = por %p662_p9, %p661_p8 }
  0x2c   : > { %p665_p4 = por %p664_p6, %p663_p10 }
  0x2e   : > { %p666_p1 = pnand %p665_p4, %p659_p3 }
  0x30   : > { %669 = shalt.err (!%p666_p1)
}
  0x31   : > { %s670_s24 = scalar_lea.vmem %s890_s29, 512  ;;  %s758_s27 = smov [#allocation6]  }
  0x32   : > { %p671_p5 = scmp.ne.s32.totalorder %s890_s29, %s670_s24  ;;  %s675_s8 = sshll.u32 %s758_s27, 4  ;;  %s676_s8 = int_to_ptr.vmem [resolvable:$false] %s675_s8 }
  0x33   : > { %s677_s14 = scalar_lea.vmem %s676_s8, 1024  ;;  %p678_p11 = scmp.lt.s32.totalorder %s890_s29, %s676_s8 }
  0x34   : > { %p673_p0 = pnand %p671_p5, %p657_p2  ;;  %p679_p8 = scmp.lt.s32.totalorder %s677_s14, %s670_s24 }
  0x36   : > { %p674_p12 = pneg %p673_p0  ;;  %p680_p9 = por %p679_p8, %p678_p11 }
  0x38   : > { %p681_p10 = pnand %p680_p9, %p674_p12 }
  0x3a   : > { %684 = shalt.err (!%p681_p10)
}
  0x3b   : > { %s759_s16 = smov 128   ;;  %s760_s17 = smov 8  }
  0x3c   : > { %580 = dma.hbm_to_vmem [thread:$0]  (!%p869_p7), %s888_s19, 512, %s890_s29, %s892_s30, %s759_s16, %s759_s16, %s760_s17  }
  0x3d   : > { %142 = sbr.rel (%p855_p13) target bundleno = 303 (0x12f), region = 28  ;;  %p1189_p1 = scmp.eq.s32.totalorder (!%p855_p13), %s816_s13, 0 }
  0x44   : > { %730 = dma.done.wait (%p1189_p1), [#allocation5], 16   ;;  %p1190_p2 = pmov %p1189_p1 }
  0x45   : > { %s927_s28 = sand.u32 1, %s747_s10   ;;  %p1191_p11 = scmp.ne.s32.totalorder %s1183_s20, 0 }
  0x46   : > { %732 = vsyncadd (%p1190_p2), [#allocation5], 4294967280  ;;  %s540_s3 = sshll.u32 %s927_s28, 5  ;;  %s149_s25 = scalar_lea.sflag [#allocation3], %s927_s28 }
  0x47   : > { %s931_s4 = scalar_lea.vmem [#allocation6], %s540_s3 }
  0x48   : > { %734 = dma.done.wait (%p1191_p11), %s149_s25, 512  }
  0x49   : > { %736 = vsyncadd (%p1191_p11), %s149_s25, 4294966784 }
  0x4a   : > { %157 = sfence }
  0x4b   : > { %s174_s23 = sld [smem:[#allocation2]]  ;;  %s542_s26 = sld [smem:[#allocation2 + $0x1]]  ;;  %v191_v0 = vld [vmem:[%s931_s4] sm:$0xff]  ;;  %v192_v14 = vld [vmem:[%s931_s4 + $0x8] sm:$0xff]  ;;  %v263_v48 = vld [vmem:[%s931_s4 + $0x10] sm:$0xff] }
  0x4c   : > { %s543_s19 = sld [smem:[#allocation2 + $0x2]]  ;;  %s544_s29 = sld [smem:[#allocation2 + $0x3]]  ;;  %v196_v1 = vld [vmem:[%s931_s4 + $0x1] sm:$0xff]  ;;  %v197_v15 = vld [vmem:[%s931_s4 + $0x9] sm:$0xff]  ;;  %v235_v63 = vld [vmem:[%s931_s4 + $0x11] sm:$0xff] }
  0x4d   : > { %s937_s30 = sld [smem:[#allocation2 + $0x4]]  ;;  %s939_s5 = sld [smem:[#allocation2 + $0x5]]  ;;  %v201_v2 = vld [vmem:[%s931_s4 + $0x2] sm:$0xff]  ;;  %v202_v20 = vld [vmem:[%s931_s4 + $0xa] sm:$0xff] }
  0x4e   : > { %s941_s6 = sld [smem:[#allocation2 + $0x6]]  ;;  %s943_s7 = sld [smem:[#allocation2 + $0x7]]  ;;  %v206_v3 = vld [vmem:[%s931_s4 + $0x3] sm:$0xff]  ;;  %v207_v21 = vld [vmem:[%s931_s4 + $0xb] sm:$0xff] }
  0x4f   : > { %s945_s20 = sld [smem:[#allocation2 + $0x8]]  ;;  %s947_s24 = sld [smem:[#allocation2 + $0x9]]  ;;  %v211_v6 = vld [vmem:[%s931_s4 + $0x4] sm:$0xff]  ;;  %v212_v26 = vld [vmem:[%s931_s4 + $0xc] sm:$0xff] }
  0x50   : > { %s951_s27 = sld [smem:[#allocation2 + $0xa]]  ;;  %s953_s8 = sld [smem:[#allocation2 + $0xb]]  ;;  %v216_v7 = vld [vmem:[%s931_s4 + $0x5] sm:$0xff]  ;;  %v217_v27 = vld [vmem:[%s931_s4 + $0xd] sm:$0xff] }
  0x51   : > { %s957_s14 = sld [smem:[#allocation2 + $0xc]]  ;;  %s959_s16 = sld [smem:[#allocation2 + $0xd]]  ;;  %v961_v4 = vstv %s174_s23  ;;  %v963_v5 = vstv %s542_s26  ;;  %v221_v12 = vld [vmem:[%s931_s4 + $0x6] sm:$0xff]  ;;  %v222_v32 = vld [vmem:[%s931_s4 + $0xe] sm:$0xff] }
  0x52   : > { %s967_s17 = sld [smem:[#allocation2 + $0xe]]  ;;  %s969_s3 = sld [smem:[#allocation2 + $0xf]]  ;;  %v194_v8 = vmul.f32 %v961_v4, %v191_v0  ;;  %v199_v9 = vmul.f32 %v963_v5, %v196_v1  ;;  %v973_v10 = vstv %s543_s19  ;;  %v975_v11 = vstv %s544_s29  ;;  %v226_v13 = vld [vmem:[%s931_s4 + $0x7] sm:$0xff]  ;;  %v227_v33 = vld [vmem:[%s931_s4 + $0xf] sm:$0xff] }
  0x53   : > { %s979_s25 = sld [smem:[#allocation2 + $0x10]]  ;;  %v204_v16 = vmul.f32 %v973_v10, %v201_v2  ;;  %v209_v17 = vmul.f32 %v975_v11, %v206_v3  ;;  %v986_v18 = vstv %s937_s30  ;;  %v989_v19 = vstv %s939_s5  ;;  %v239_v0 = vld [vmem:[%s931_s4 + $0x12] sm:$0xff]  ;;  %s761_s23 = smov 126  }
  0x54   : > { %v214_v22 = vmul.f32 %v986_v18, %v211_v6  ;;  %v219_v23 = vmul.f32 %v989_v19, %v216_v7  ;;  %v996_v24 = vstv %s941_s6  ;;  %v999_v25 = vstv %s943_s7  ;;  %v243_v7 = vld [vmem:[%s931_s4 + $0x13] sm:$0xff]  ;;  %s762_s26 = smov 127   ;;  %s763_s19 = smov 125  }
  0x55   : > { %v224_v28 = vmul.f32 %v996_v24, %v221_v12  ;;  %v229_v29 = vmul.f32 %v999_v25, %v226_v13  ;;  %v1006_v30 = vstv %s945_s20  ;;  %v1009_v31 = vstv %s947_s24  ;;  %s764_s29 = smov 124   ;;  %s766_s30 = smov 122  }
  0x56   : > { %v233_v34 = vmul.f32 %v1006_v30, %v192_v14  ;;  %v237_v35 = vmul.f32 %v1009_v31, %v197_v15  ;;  %v1016_v36 = vstv %s951_s27  ;;  %v1019_v37 = vstv %s953_s8  ;;  %s767_s5 = smov 121   ;;  %s768_s6 = smov 120  }
  0x57   : > { %v241_v38 = vmul.f32 %v1016_v36, %v202_v20  ;;  %v245_v39 = vmul.f32 %v1019_v37, %v207_v21  ;;  %v1024_v40 = vstv %s957_s14  ;;  %v1027_v41 = vstv %s959_s16  ;;  %s769_s7 = smov 119   ;;  %s770_s20 = smov 118  }
  0x58   : > { %v249_v42 = vmul.f32 %v1024_v40, %v212_v26  ;;  %v253_v43 = vmul.f32 %v1027_v41, %v217_v27  ;;  %v1032_v44 = vstv %s967_s17  ;;  %v1035_v45 = vstv %s969_s3  ;;  %s771_s24 = smov 117   ;;  %s772_s27 = smov 116  }
  0x59   : > { %v257_v46 = vmul.f32 %v1032_v44, %v222_v32  ;;  %v261_v47 = vmul.f32 %v1035_v45, %v227_v33  ;;  %v1041_v49 = vstv %s979_s25  ;;  %v268_v50 = vadd.f32 %v199_v9, %v194_v8  ;;  %v247_v8 = vld [vmem:[%s931_s4 + $0x14] sm:$0xff]  ;;  %s773_s8 = smov 115   ;;  %s774_s14 = smov 114  }
  0x5a   : > { %v266_v51 = vmul.f32 %v1041_v49, %v263_v48  ;;  %v270_v52 = vadd.f32 %v209_v17, %v204_v16  ;;  %v272_v53 = vadd.f32 %v219_v23, %v214_v22  ;;  %v274_v54 = vadd.f32 %v229_v29, %v224_v28  ;;  %v251_v9 = vld [vmem:[%s931_s4 + $0x15] sm:$0xff]  ;;  %s775_s16 = smov 113   ;;  %s776_s17 = smov 112  }
  0x5b   : > { %v276_v55 = vadd.f32 %v237_v35, %v233_v34  ;;  %v278_v56 = vadd.f32 %v245_v39, %v241_v38  ;;  %v280_v57 = vadd.f32 %v253_v43, %v249_v42  ;;  %v282_v58 = vadd.f32 %v261_v47, %v257_v46  ;;  %v255_v17 = vld [vmem:[%s931_s4 + $0x16] sm:$0xff]  ;;  %s541_s3 = sshll.u32 %s927_s28, 4  ;;  %p1192_p13 = scmp.ne.s32.totalorder %s1184_s21, 0 }
  0x5c   : > { %v284_v59 = vadd.f32 %v270_v52, %v268_v50  ;;  %v286_v60 = vadd.f32 %v274_v54, %v272_v53  ;;  %v195_v61 = vmul.f32 %v961_v4, %v192_v14  ;;  %v200_v62 = vmul.f32 %v963_v5, %v197_v15  ;;  %v259_v15 = vld [vmem:[%s931_s4 + $0x17] sm:$0xff]  ;;  %s173_s25 = scalar_lea.vmem [#allocation7], %s541_s3 }
  0x5d   : > { %v288_v1 = vadd.f32 %v278_v56, %v276_v55  ;;  %v290_v2 = vadd.f32 %v282_v58, %v280_v57  ;;  %v205_v3 = vmul.f32 %v973_v10, %v202_v20  ;;  %v210_v6 = vmul.f32 %v975_v11, %v207_v21  ;;  %v264_v54 = vld [vmem:[%s931_s4 + $0x18] sm:$0xff]  ;;  %s765_s4 = smov 123  }
  0x5e   : > { %v292_v12 = vadd.f32 %v286_v60, %v284_v59  ;;  %v215_v13 = vmul.f32 %v986_v18, %v212_v26  ;;  %v220_v16 = vmul.f32 %v989_v19, %v217_v27  ;;  %v225_v14 = vmul.f32 %v996_v24, %v222_v32 }
  0x5f   : > { %v294_v22 = vadd.f32 %v290_v2, %v288_v1  ;;  %v230_v23 = vmul.f32 %v999_v25, %v227_v33  ;;  %v234_v28 = vmul.f32 %v263_v48, %v1006_v30  ;;  %v238_v20 = vmul.f32 %v1009_v31, %v235_v63 }
  0x60   : > { %v242_v21 = vmul.f32 %v1016_v36, %v239_v0  ;;  %v246_v29 = vmul.f32 %v1019_v37, %v243_v7  ;;  %v250_v34 = vmul.f32 %v1024_v40, %v247_v8  ;;  %v254_v26 = vmul.f32 %v1027_v41, %v251_v9 }
  0x61   : > { %v296_v27 = vadd.f32 %v294_v22, %v292_v12  ;;  %v258_v32 = vmul.f32 %v1032_v44, %v255_v17  ;;  %v262_v35 = vmul.f32 %v1035_v45, %v259_v15  ;;  %v269_v38 = vadd.f32 %v200_v62, %v195_v61 }
  0x62   : > { %v271_v33 = vadd.f32 %v210_v6, %v205_v3  ;;  %v273_v39 = vadd.f32 %v220_v16, %v215_v13  ;;  %v275_v42 = vadd.f32 %v230_v23, %v225_v14  ;;  %v277_v46 = vadd.f32 %v238_v20, %v234_v28 }
  0x63   : > { %v1067_v43 = vadd.f32 %v296_v27, %v266_v51  ;;  %v279_v47 = vadd.f32 %v246_v29, %v242_v21  ;;  %v281_v48 = vadd.f32 %v254_v26, %v250_v34  ;;  %v283_v50 = vadd.f32 %v262_v35, %v258_v32 }
  0x64   : > { %v285_v52 = vadd.f32 %v271_v33, %v269_v38  ;;  %v287_v53 = vadd.f32 %v275_v42, %v273_v39  ;;  %v267_v58 = vmul.f32 %v1041_v49, %v264_v54 }
  0x65   : > { %308 = vrot.lane.b32.xlu1 %v1067_v43, %s761_s23  ;;  %302 = vrot.lane.b32.xlu0 %v1067_v43, %s762_s26  ;;  %v289_v55 = vadd.f32 %v279_v47, %v277_v46  ;;  %v291_v56 = vadd.f32 %v283_v50, %v281_v48  ;;  %v300_v27 = vmul.f32 %v1067_v43, %v961_v4 }
  0x66   : > { %v293_v57 = vadd.f32 %v287_v53, %v285_v52 }
  0x67   : > { %v295_v51 = vadd.f32 %v291_v56, %v289_v55 }
  0x69   : > { %v297_v59 = vadd.f32 %v295_v51, %v293_v57 }
  0x6b   : > { %v299_v60 = vadd.f32 %v297_v59, %v267_v58 }
  0x6d   : > { %310 = vrot.lane.b32.xlu1 %v299_v60, %s761_s23  ;;  %304 = vrot.lane.b32.xlu0 %v299_v60, %s762_s26  ;;  %v1074_v61 = vmul.f32 %v299_v60, %v961_v4  ;;  %s446_s23 = sshll.u32 %s173_s25, 4  ;;  %s564_s26 = sshll.u32 %s816_s13, 8  ;;  %s1127_s23 = int_to_ptr.vmem [resolvable:$true] %s446_s23 }
  0x6e   : > { %s777_s13 = smov [#allocation7]  }
  0x71   : > { %316 = vrot.lane.b32.xlu1 %v299_v60, %s763_s19  ;;  %314 = vrot.lane.b32.xlu0 %v1067_v43, %s763_s19 }
  0x75   : > { %322 = vrot.lane.b32.xlu1 %v299_v60, %s764_s29  ;;  %320 = vrot.lane.b32.xlu0 %v1067_v43, %s764_s29 }
  0x79   : > { %328 = vrot.lane.b32.xlu1 %v299_v60, %s765_s4  ;;  %326 = vrot.lane.b32.xlu0 %v1067_v43, %s765_s4  ;;  %s1132_s4 = scalar_lea.hbm %s1178_s2, %s564_s26 }
  0x7d   : > { %334 = vrot.lane.b32.xlu1 %v299_v60, %s766_s30  ;;  %332 = vrot.lane.b32.xlu0 %v1067_v43, %s766_s30  ;;  %s433_s30 = scalar_lea.sflag [#allocation4], %s927_s28 }
  0x81   : > { %340 = vrot.lane.b32.xlu1 %v299_v60, %s767_s5  ;;  %338 = vrot.lane.b32.xlu0 %v1067_v43, %s767_s5  ;;  %s685_s5 = scalar_lea.vmem %s1127_s23, 256 }
  0x82   : > { %p686_p12 = scmp.ne.s32.totalorder %s1127_s23, %s685_s5 }
  0x84   : > { %p687_p7 = pnand %p686_p12, %p1192_p13 }
  0x85   : > { %346 = vrot.lane.b32.xlu1 %v299_v60, %s768_s6  ;;  %344 = vrot.lane.b32.xlu0 %v1067_v43, %s768_s6  ;;  %s689_s6 = sshll.u32 %s777_s13, 4  ;;  %s690_s6 = int_to_ptr.vmem [resolvable:$false] %s689_s6 }
  0x86   : > { %p688_p3 = pneg %p687_p7  ;;  %p692_p6 = scmp.lt.s32.totalorder %s1127_s23, %s690_s6 }
  0x89   : > { %352 = vrot.lane.b32.xlu1 %v299_v60, %s769_s7  ;;  %350 = vrot.lane.b32.xlu0 %v1067_v43, %s769_s7  ;;  %s691_s7 = scalar_lea.vmem %s690_s6, 512 }
  0x8a   : > { %p693_p4 = scmp.lt.s32.totalorder %s691_s7, %s685_s5 }
  0x8c   : > { %p694_p5 = por %p693_p4, %p692_p6 }
  0x8d   : > { %358 = vrot.lane.b32.xlu1 %v299_v60, %s770_s20  ;;  %356 = vrot.lane.b32.xlu0 %v1067_v43, %s770_s20 }
  0x8e   : > { %p695_p0 = pnand %p694_p5, %p688_p3 }
  0x91   : > { %364 = vrot.lane.b32.xlu1 %v299_v60, %s771_s24  ;;  %362 = vrot.lane.b32.xlu0 %v1067_v43, %s771_s24 }
  0x95   : > { %370 = vrot.lane.b32.xlu1 %v299_v60, %s772_s27  ;;  %368 = vrot.lane.b32.xlu0 %v1067_v43, %s772_s27 }
  0x99   : > { %376 = vrot.lane.b32.xlu1 %v299_v60, %s773_s8  ;;  %374 = vrot.lane.b32.xlu0 %v1067_v43, %s773_s8 }
  0x9d   : > { %382 = vrot.lane.b32.xlu1 %v299_v60, %s774_s14  ;;  %380 = vrot.lane.b32.xlu0 %v1067_v43, %s774_s14 }
  0xa1   : > { %388 = vrot.lane.b32.xlu1 %v299_v60, %s775_s16  ;;  %386 = vrot.lane.b32.xlu0 %v1067_v43, %s775_s16 }
  0xa5   : > { %394 = vrot.lane.b32.xlu1 %v299_v60, %s776_s17  ;;  %392 = vrot.lane.b32.xlu0 %v1067_v43, %s776_s17 }
  0xd7   : > { %v309_v62 = vpop.permute.xlu1 %308  ;;  %v303_v63 = vpop.permute.xlu0 %302 }
  0xd8   : > { %v306_v32 = vmul.f32 %v303_v63, %v963_v5  ;;  %v312_v4 = vmul.f32 %v309_v62, %v973_v10 }
  0xda   : > { %v398_v43 = vadd.f32 %v306_v32, %v300_v27 }
  0xdf   : > { %v311_v0 = vpop.permute.xlu1 %310  ;;  %v305_v1 = vpop.permute.xlu0 %304 }
  0xe0   : > { %v307_v35 = vmul.f32 %v305_v1, %v963_v5  ;;  %v313_v52 = vmul.f32 %v311_v0, %v973_v10 }
  0xe2   : > { %v399_v5 = vadd.f32 %v307_v35, %v1074_v61 }
  0xe3   : > { %v317_v2 = vpop.permute.xlu1 %316  ;;  %v315_v3 = vpop.permute.xlu0 %314 }
  0xe4   : > { %v319_v38 = vmul.f32 %v317_v2, %v975_v11  ;;  %v318_v33 = vmul.f32 %v315_v3, %v975_v11 }
  0xe6   : > { %v400_v56 = vadd.f32 %v318_v33, %v312_v4 }
  0xe7   : > { %v323_v6 = vpop.permute.xlu1 %322  ;;  %v321_v7 = vpop.permute.xlu0 %320 }
  0xe8   : > { %v325_v53 = vmul.f32 %v323_v6, %v986_v18  ;;  %v324_v11 = vmul.f32 %v321_v7, %v986_v18 }
  0xeb   : > { %v329_v8 = vpop.permute.xlu1 %328  ;;  %v327_v9 = vpop.permute.xlu0 %326 }
  0xec   : > { %v331_v46 = vmul.f32 %v329_v8, %v989_v19  ;;  %v330_v47 = vmul.f32 %v327_v9, %v989_v19  ;;  %v401_v19 = vadd.f32 %v319_v38, %v313_v52 }
  0xee   : > { %v403_v59 = vadd.f32 %v331_v46, %v325_v53  ;;  %v402_v10 = vadd.f32 %v330_v47, %v324_v11 }
  0xef   : > { %v335_v12 = vpop.permute.xlu1 %334  ;;  %v333_v13 = vpop.permute.xlu0 %332 }
  0xf0   : > { %v337_v54 = vmul.f32 %v335_v12, %v996_v24  ;;  %v336_v55 = vmul.f32 %v333_v13, %v996_v24 }
  0xf3   : > { %v341_v16 = vpop.permute.xlu1 %340  ;;  %v339_v14 = vpop.permute.xlu0 %338 }
  0xf4   : > { %v343_v48 = vmul.f32 %v341_v16, %v999_v25  ;;  %v342_v50 = vmul.f32 %v339_v14, %v999_v25 }
  0xf6   : > { %v405_v60 = vadd.f32 %v343_v48, %v337_v54  ;;  %v404_v61 = vadd.f32 %v342_v50, %v336_v55 }
  0xf7   : > { %v347_v17 = vpop.permute.xlu1 %346  ;;  %v345_v15 = vpop.permute.xlu0 %344 }
  0xf8   : > { %v349_v0 = vmul.f32 %v347_v17, %v1006_v30  ;;  %v348_v1 = vmul.f32 %v345_v15, %v1006_v30  ;;  %v417_v16 = vadd.f32 %v405_v60, %v403_v59  ;;  %v416_v14 = vadd.f32 %v404_v61, %v402_v10 }
  0xfb   : > { %v353_v22 = vpop.permute.xlu1 %352  ;;  %v351_v23 = vpop.permute.xlu0 %350 }
  0xfc   : > { %v355_v62 = vmul.f32 %v353_v22, %v1009_v31  ;;  %v354_v18 = vmul.f32 %v351_v23, %v1009_v31 }
  0xfe   : > { %v406_v17 = vadd.f32 %v354_v18, %v348_v1 }
  0xff   : > { %v359_v28 = vpop.permute.xlu1 %358  ;;  %v357_v20 = vpop.permute.xlu0 %356 }
 0x100   : > { %v361_v63 = vmul.f32 %v359_v28, %v1016_v36  ;;  %v360_v24 = vmul.f32 %v357_v20, %v1016_v36  ;;  %v414_v20 = vadd.f32 %v400_v56, %v398_v43 }
 0x103   : > { %v365_v21 = vpop.permute.xlu1 %364  ;;  %v363_v29 = vpop.permute.xlu0 %362 }
 0x104   : > { %v367_v57 = vmul.f32 %v365_v21, %v1019_v37  ;;  %v366_v25 = vmul.f32 %v363_v29, %v1019_v37 }
 0x106   : > { %v409_v3 = vadd.f32 %v367_v57, %v361_v63  ;;  %v408_v6 = vadd.f32 %v366_v25, %v360_v24 }
 0x107   : > { %v371_v34 = vpop.permute.xlu1 %370  ;;  %v369_v26 = vpop.permute.xlu0 %368 }
 0x108   : > { %v373_v7 = vmul.f32 %v371_v34, %v1024_v40  ;;  %v372_v8 = vmul.f32 %v369_v26, %v1024_v40  ;;  %v415_v40 = vadd.f32 %v401_v19, %v399_v5  ;;  %v418_v26 = vadd.f32 %v408_v6, %v406_v17 }
 0x10a   : > { %v423_v32 = vadd.f32 %v417_v16, %v415_v40 }
 0x10b   : > { %v377_v39 = vpop.permute.xlu1 %376  ;;  %v375_v42 = vpop.permute.xlu0 %374 }
 0x10c   : > { %v379_v37 = vmul.f32 %v377_v39, %v1027_v41  ;;  %v378_v2 = vmul.f32 %v375_v42, %v1027_v41  ;;  %v407_v41 = vadd.f32 %v355_v62, %v349_v0 }
 0x10e   : > { %v411_v15 = vadd.f32 %v379_v37, %v373_v7  ;;  %v410_v22 = vadd.f32 %v378_v2, %v372_v8  ;;  %v419_v34 = vadd.f32 %v409_v3, %v407_v41 }
 0x10f   : > { %v383_v58 = vpop.permute.xlu1 %382  ;;  %v381_v51 = vpop.permute.xlu0 %380 }
 0x110   : > { %v385_v12 = vmul.f32 %v383_v58, %v1032_v44  ;;  %v384_v36 = vmul.f32 %v381_v51, %v1032_v44 }
 0x113   : > { %v389_v9 = vpop.permute.xlu1 %388  ;;  %v387_v31 = vpop.permute.xlu0 %386 }
 0x114   : > { %v391_v13 = vmul.f32 %v389_v9, %v1035_v45  ;;  %v390_v30 = vmul.f32 %v387_v31, %v1035_v45  ;;  %v422_v45 = vadd.f32 %v416_v14, %v414_v20 }
 0x116   : > { %v413_v23 = vadd.f32 %v391_v13, %v385_v12  ;;  %v412_v28 = vadd.f32 %v390_v30, %v384_v36 }
 0x117   : > { %v395_v21 = vpop.permute.xlu1 %394  ;;  %v393_v29 = vpop.permute.xlu0 %392 }
 0x118   : > { %v421_v44 = vadd.f32 %v413_v23, %v411_v15  ;;  %v420_v27 = vadd.f32 %v412_v28, %v410_v22  ;;  %v397_v38 = vmul.f32 %v395_v21, %v1041_v49  ;;  %v396_v39 = vmul.f32 %v393_v29, %v1041_v49 }
 0x11a   : > { %v425_v35 = vadd.f32 %v421_v44, %v419_v34  ;;  %v424_v33 = vadd.f32 %v420_v27, %v418_v26 }
 0x11c   : > { %v427_v42 = vadd.f32 %v425_v35, %v423_v32  ;;  %v426_v46 = vadd.f32 %v424_v33, %v422_v45 }
 0x11e   : > { %v429_v47 = vadd.f32 %v427_v42, %v397_v38  ;;  %v428_v48 = vadd.f32 %v426_v46, %v396_v39 }
 0x120   : > { %431 = vst [vmem:[%s173_s25 + $0x8] sm:$0xff] %v429_v47  ;;  %430 = vst [vmem:[%s173_s25] sm:$0xff] %v428_v48 }
 0x121   : > { %698 = shalt.err (!%p695_p0)
}
 0x122   : > { %s699_s20 = scalar_lea.hbm %s1132_s4, 256  ;;  %s703_s8 = scalar_lea.hbm %s1178_s2, 512 }
 0x123   : > { %p700_p8 = scmp.ne.s32.totalorder %s1132_s4, %s699_s20  ;;  %p704_p1 = scmp.lt.u32.totalorder %s1132_s4, %s1178_s2 }
 0x124   : > { %p705_p2 = scmp.lt.u32.totalorder %s703_s8, %s699_s20  ;;  %p707_p12 = scmp.lt.u32.totalorder %s699_s20, %s1132_s4 }
 0x125   : > { %p701_p9 = pnand %p700_p8, %p1192_p13 }
 0x126   : > { %p706_p11 = por %p705_p2, %p704_p1 }
 0x127   : > { %p702_p10 = pneg %p701_p9 }
 0x128   : > { %p708_p7 = por %p707_p12, %p706_p11 }
 0x12a   : > { %p709_p3 = pnand %p708_p7, %p702_p10 }
 0x12c   : > { %712 = shalt.err (!%p709_p3)
}
 0x12d   : > { %s778_s17 = smov 128   ;;  %s779_s3 = smov 8  }
 0x12e   : > { %571 = dma.vmem_to_hbm [thread:$0]  (%p1192_p13), %s1127_s23, 256, %s1132_s4, %s433_s30, %s778_s17, %s778_s17, %s779_s3  }
 0x12f PF: > { %s461_s25 = sand.u32 1, %s743_s9   ;;  %p1193_p6 = scmp.ne.s32.totalorder %s1185_s22, 0 }
 0x130   : > { %p1194_p4 = scmp.ge.s32.totalorder %s755_s12, 2  ;;  %s462_s26 = scalar_lea.sflag [#allocation4], %s461_s25 }
 0x132   : > { %p582_p5 = pnand %p1194_p4, %p1193_p6 }
 0x134   : > { %738 = dma.done.wait (!%p582_p5), %s462_s26, 256  }
 0x135   : > { %740 = vsyncadd (!%p582_p5), %s462_s26, 4294967040  ;;  %p16_p0 = scmp.ge.s32.totalorder %s820_s15, 4   ;;  %s1195_s9 = smov %s747_s10 }
 0x136   : > { %s1196_s10 = smov %s751_s11  ;;  %s1197_s11 = smov %s832_s18 }
 0x137   : > { %s1198_s12 = smov %s820_s15  ;;  %18 = sbr.rel (!%p16_p0) target bundleno = 6 (0x6), region = 78 }
 0x13e   :  { %467 = vsyncpa [#allocation3], 1 }
 0x13f   :  { %469 = vsyncpa [#allocation3 + $0x1], 1 }
 0x140   :  { %470 = vsyncpa [#allocation4], 1 }
 0x141   :  { %472 = vsyncpa [#allocation4 + $0x1], 1 }
 0x142   :  { %473 = vsyncpa [#allocation5], 1 }
 0x143   :  { %475 = vsyncpa [#allocation5 + $0x1], 1 }

</bundles_post_ra>
